<compile_context>
chip_gen: v5e
topology: v5e:2x2
jax: 0.10.0
libtpu: 0.0.40
codegen_flags: <defaults>
</compile_context>

<pallas_src>
import functools

import jax
import jax.numpy as jnp
import numpy as np
from jax.experimental import pallas as pl
from jax.experimental.pallas import tpu as pltpu


def _window_sums_logtree(slab, kernel_size):
    """Stride-1 sliding-window sums of width kernel_size along axis 1.

    slab: (bt, n, ce) float32 value with n >= kernel_size.
    Returns (bt, n - kernel_size + 1, ce): out[:, j, :] = sum_{t=j..j+k-1} slab[:, t, :].
    Uses doubling partial sums (no cancellation, unlike cumsum-then-difference).
    """
    _, n, _ = slab.shape
    k = kernel_size
    nw = n - k + 1
    if k == 1:
        return slab
    needed = {}          # power-of-two chunk -> partial-sum slab S_m (valid length n-m+1)
    cur = slab           # S_1
    m = 1
    top = 1 << (k.bit_length() - 1)
    while True:
        if k & m:
            needed[m] = cur
        if m == top:
            break
        nxt = n - 2 * m + 1
        cur = cur[:, 0:nxt, :] + cur[:, m:m + nxt, :]   # S_{2m}[j] = S_m[j] + S_m[j+m]
        m *= 2
    acc = None
    off = 0
    for mm in sorted(needed.keys(), reverse=True):
        part = needed[mm][:, off:off + nw, :]
        acc = part if acc is None else acc + part
        off += mm
    return acc


def _moving_avg_kernel(x_ref, o_ref, *scratch, kernel_size: int, stride: int,
                       pad: int, direct: bool):
    """x_ref: (Bt, L, C) unpadded input tile; o_ref: (Bt, Lout, C) output tile."""
    bt, L, ce = x_ref.shape
    lout = o_ref.shape[1]
    inv_k = 1.0 / kernel_size

    # Single load + single widening cast (f32 accumulation also required on v5e).
    xv = x_ref[...].astype(jnp.float32)

    if direct:
        # stride == 1 and L >= kernel_size: no padded slab is ever materialized.
        lint = L - kernel_size + 1
        w_int = _window_sums_logtree(xv, kernel_size)              # (bt, lint, ce)
        o_ref[:, pad:pad + lint, :] = (w_int * inv_k).astype(o_ref.dtype)
        if pad > 0:
            x0 = xv[:, 0:1, :]
            xl = xv[:, L - 1:L, :]
            # Front rows i = pad-1 .. 0:  W[i] = W[i+1] + x[0] - x[i + k - pad]
            w = w_int[:, 0:1, :]
            for d in range(pad):
                w = w + x0 - xv[:, kernel_size - 1 - d:kernel_size - d, :]
                o_ref[:, pad - 1 - d:pad - d, :] = (w * inv_k).astype(o_ref.dtype)
            # Back rows i = pad+lint .. Lout-1:  W[i] = W[i-1] - x[i - 1 - pad] + x[L-1]
            w = w_int[:, lint - 1:lint, :]
            for d in range(pad):
                w = w - xv[:, L - kernel_size + d:L - kernel_size + d + 1, :] + xl
                i = pad + lint + d
                o_ref[:, i:i + 1, :] = (w * inv_k).astype(o_ref.dtype)
    else:
        # Fallback path (stride > 1 or L < kernel_size): replicate-pad in VMEM, then pool.
        if pad > 0:
            first = jnp.broadcast_to(xv[:, 0:1, :], (bt, pad, ce))
            last = jnp.broadcast_to(xv[:, L - 1:L, :], (bt, pad, ce))
            xp = jnp.concatenate([first, xv, last], axis=1)
        else:
            xp = xv
        avg = _window_sums_logtree(xp, kernel_size) * inv_k        # (bt, lfull, ce)
        if stride == 1:
            o_ref[...] = avg.astype(o_ref.dtype)
        else:
            # Write the stride-1 result once, subsample with a single strided ref read.
            (s_ref,) = scratch
            s_ref[...] = avg
            o_ref[...] = s_ref[:, pl.ds(0, lout, stride=stride), :].astype(o_ref.dtype)


def moving_avg_forward(x: jax.Array, kernel_size: int, stride: int) -> jax.Array:
    """Equivalent of moving_avg(kernel_size, stride).forward(x), x of shape (B, L, C)."""
    assert x.ndim == 3, "expected (batch, time, channels)"
    B, L, C = x.shape
    pad = (kernel_size - 1) // 2
    Lp = L + 2 * pad
    Lout = (Lp - kernel_size) // stride + 1
    Lfull = Lp - kernel_size + 1
    if Lout <= 0:
        raise ValueError("kernel_size too large for this sequence length")

    direct = (stride == 1) and (L >= kernel_size)

    # ---- VMEM working-set estimate per batch row. ----
    itemsize = x.dtype.itemsize
    n = L if direct else Lp
    live_slabs = 3 + bin(kernel_size).count("1")      # loaded tile + kept partials + working
    tmp_row = live_slabs * n * C * 4
    if not direct:
        tmp_row += Lp * C * 4                         # padded slab
    if stride > 1:
        tmp_row += Lfull * C * 4                      # stride-1 scratch buffer
    io_row = 2 * (L * C + Lout * C) * itemsize        # double-buffered in + out tiles
    per_row = tmp_row + io_row

    # ---- Generation-aware VMEM budget (64 MiB v7x, 128 MiB v5e/v6e). ----
    try:
        vmem_cap = int(pltpu.get_tpu_info().vmem_capacity_bytes)
    except Exception:
        vmem_cap = 64 * 1024 * 1024                   # conservative default: v7x
    budget = vmem_cap // 4                            # soft per-step working-set target
    hard_cap = int(vmem_cap * 0.65)

    # ---- Batch tiling: largest divisor of B within budget AND keeping >= ~4 grid steps. ----
    min_steps = 4
    bt_step_cap = max(1, B // min_steps)
    bt_budget_cap = max(1, budget // per_row)
    bt_cap = min(B, bt_step_cap, bt_budget_cap)
    Bt = 1
    for cand in range(bt_cap, 0, -1):
        if B % cand == 0:
            Bt = cand
            break

    need = Bt * per_row
    if need > hard_cap:
        # TODO(synk): add a time-tiled grid axis with a (kernel_size-1) halo for very long L.
        raise ValueError(
            f"moving_avg tile needs ~{need >> 20} MiB VMEM (cap ~{hard_cap >> 20} MiB); "
            "sequence/channel size too large for the single-time-tile kernel."
        )
    vmem_limit = int(min(int(vmem_cap * 0.75), max(2 * need, 32 * 1024 * 1024)))

    scratch_shapes = []
    if stride > 1:
        scratch_shapes.append(pltpu.VMEM((Bt, Lfull, C), jnp.float32))

    kernel = functools.partial(
        _moving_avg_kernel, kernel_size=kernel_size, stride=stride, pad=pad, direct=direct
    )

    return pl.pallas_call(
        kernel,
        out_shape=jax.ShapeDtypeStruct((B, Lout, C), x.dtype),
        grid=(B // Bt,),
        in_specs=[pl.BlockSpec((Bt, L, C), lambda b: (b, 0, 0))],
        out_specs=pl.BlockSpec((Bt, Lout, C), lambda b: (b, 0, 0)),
        scratch_shapes=scratch_shapes,
        compiler_params=pltpu.CompilerParams(
            dimension_semantics=("parallel",),
            vmem_limit_bytes=vmem_limit,
        ),
    )(x)


def _reference(x, kernel_size, stride):
    """Plain-JAX reference mirroring torch AvgPool1d on the replicate-padded input."""
    pad = (kernel_size - 1) // 2
    front = jnp.repeat(x[:, 0:1, :], pad, axis=1)
    end = jnp.repeat(x[:, -1:, :], pad, axis=1)
    xp = jnp.concatenate([front, x, end], axis=1)
    Lp = xp.shape[1]
    Lout = (Lp - kernel_size) // stride + 1
    outs = [
        jnp.mean(xp[:, t * stride: t * stride + kernel_size, :], axis=1)
        for t in range(Lout)
    ]
    return jnp.stack(outs, axis=1)


if __name__ == "__main__":
    key = jax.random.PRNGKey(0)
    k1, k2 = jax.random.split(key)

    # Case 1: typical decomposition setting (kernel_size=5, stride=1) -> direct path.
    x = jax.random.normal(k1, (2, 16, 32), dtype=jnp.float32)
    out1 = jax.block_until_ready(moving_avg_forward(x, 5, 1))
    ref1 = _reference(x, 5, 1)
    assert out1.shape == ref1.shape, (out1.shape, ref1.shape)
    np.testing.assert_allclose(np.asarray(out1), np.asarray(ref1), rtol=1e-5, atol=1e-5)

    # Case 2: strided pooling path (kernel_size=4, stride=2) -> padded + scratch path.
    out2 = jax.block_until_ready(moving_avg_forward(x, 4, 2))
    ref2 = _reference(x, 4, 2)
    assert out2.shape == ref2.shape, (out2.shape, ref2.shape)
    np.testing.assert_allclose(np.asarray(out2), np.asarray(ref2), rtol=1e-5, atol=1e-5)

    # Case 3: Autoformer-realistic window (kernel_size=25, stride=1, L=96) ->
    # deep log-tree + 12 boundary-corrected rows on each end.
    x3 = jax.random.normal(k2, (4, 96, 8), dtype=jnp.float32)
    out3 = jax.block_until_ready(moving_avg_forward(x3, 25, 1))
    ref3 = _reference(x3, 25, 1)
    assert out3.shape == ref3.shape, (out3.shape, ref3.shape)
    np.testing.assert_allclose(np.asarray(out3), np.asarray(ref3), rtol=1e-5, atol=1e-5)

    print("KERNEL_OK")
</pallas_src>

<mosaic_0001>
module attributes {stable_mosaic.version = 11 : i64} {
  func.func @_moving_avg_kernel(%arg0: i32, %arg1: memref<1x16x32xf32, #tpu.memory_space<vmem>>, %arg2: memref<1x16x32xf32, #tpu.memory_space<vmem>>) attributes {dimension_semantics = [#tpu.dimension_semantics<parallel>], iteration_bounds = array<i64: 2>, scalar_prefetch = 0 : i64, scratch_operands = 0 : i64, tpu.core_type = #tpu.core_type<tc>, window_params = [{transform_indices = @transform_0, window_bounds = array<i64: 1, 16, 32>}, {transform_indices = @transform_1, window_bounds = array<i64: 1, 16, 32>}]} {
    %c0 = arith.constant 0 : index
    %c0_0 = arith.constant 0 : index
    %c0_1 = arith.constant 0 : index
    %0 = vector.load %arg1[%c0, %c0_0, %c0_1] : memref<1x16x32xf32, #tpu.memory_space<vmem>>, vector<1x16x32xf32>
    %1 = vector.extract_strided_slice %0 {offsets = [0, 0, 0], sizes = [1, 15, 32], strides = [1, 1, 1]} : vector<1x16x32xf32> to vector<1x15x32xf32>
    %2 = vector.extract_strided_slice %0 {offsets = [0, 1, 0], sizes = [1, 15, 32], strides = [1, 1, 1]} : vector<1x16x32xf32> to vector<1x15x32xf32>
    %3 = arith.addf %1, %2 : vector<1x15x32xf32>
    %4 = vector.extract_strided_slice %3 {offsets = [0, 0, 0], sizes = [1, 13, 32], strides = [1, 1, 1]} : vector<1x15x32xf32> to vector<1x13x32xf32>
    %5 = vector.extract_strided_slice %3 {offsets = [0, 2, 0], sizes = [1, 13, 32], strides = [1, 1, 1]} : vector<1x15x32xf32> to vector<1x13x32xf32>
    %6 = arith.addf %4, %5 : vector<1x13x32xf32>
    %7 = vector.extract_strided_slice %6 {offsets = [0, 0, 0], sizes = [1, 12, 32], strides = [1, 1, 1]} : vector<1x13x32xf32> to vector<1x12x32xf32>
    %8 = vector.extract_strided_slice %0 {offsets = [0, 4, 0], sizes = [1, 12, 32], strides = [1, 1, 1]} : vector<1x16x32xf32> to vector<1x12x32xf32>
    %9 = arith.addf %7, %8 : vector<1x12x32xf32>
    %cst = arith.constant 2.000000e-01 : f32
    %10 = vector.broadcast %cst : f32 to vector<1x12x32xf32>
    %11 = arith.mulf %9, %10 : vector<1x12x32xf32>
    %c0_2 = arith.constant 0 : index
    %c2 = arith.constant 2 : index
    %c0_3 = arith.constant 0 : index
    %12 = vector.load %arg2[%c0_2, %c2, %c0_3] : memref<1x16x32xf32, #tpu.memory_space<vmem>>, vector<1x12x32xf32>
    tpu.vector_store %arg2[%c0_2, %c2, %c0_3], %11 {strides = array<i32>} : memref<1x16x32xf32, #tpu.memory_space<vmem>>, vector<1x12x32xf32>,
    %13 = vector.extract_strided_slice %0 {offsets = [0, 0, 0], sizes = [1, 1, 32], strides = [1, 1, 1]} : vector<1x16x32xf32> to vector<1x1x32xf32>
    %14 = vector.extract_strided_slice %0 {offsets = [0, 15, 0], sizes = [1, 1, 32], strides = [1, 1, 1]} : vector<1x16x32xf32> to vector<1x1x32xf32>
    %15 = vector.extract_strided_slice %9 {offsets = [0, 0, 0], sizes = [1, 1, 32], strides = [1, 1, 1]} : vector<1x12x32xf32> to vector<1x1x32xf32>
    %16 = arith.addf %15, %13 : vector<1x1x32xf32>
    %17 = vector.extract_strided_slice %0 {offsets = [0, 4, 0], sizes = [1, 1, 32], strides = [1, 1, 1]} : vector<1x16x32xf32> to vector<1x1x32xf32>
    %18 = arith.subf %16, %17 : vector<1x1x32xf32>
    %cst_4 = arith.constant 2.000000e-01 : f32
    %19 = vector.broadcast %cst_4 : f32 to vector<1x1x32xf32>
    %20 = arith.mulf %18, %19 : vector<1x1x32xf32>
    %c0_5 = arith.constant 0 : index
    %c1 = arith.constant 1 : index
    %c0_6 = arith.constant 0 : index
    %21 = vector.load %arg2[%c0_5, %c1, %c0_6] : memref<1x16x32xf32, #tpu.memory_space<vmem>>, vector<1x1x32xf32>
    tpu.vector_store %arg2[%c0_5, %c1, %c0_6], %20 {strides = array<i32>} : memref<1x16x32xf32, #tpu.memory_space<vmem>>, vector<1x1x32xf32>,
    %22 = arith.addf %18, %13 : vector<1x1x32xf32>
    %23 = vector.extract_strided_slice %0 {offsets = [0, 3, 0], sizes = [1, 1, 32], strides = [1, 1, 1]} : vector<1x16x32xf32> to vector<1x1x32xf32>
    %24 = arith.subf %22, %23 : vector<1x1x32xf32>
    %cst_7 = arith.constant 2.000000e-01 : f32
    %25 = vector.broadcast %cst_7 : f32 to vector<1x1x32xf32>
    %26 = arith.mulf %24, %25 : vector<1x1x32xf32>
    %c0_8 = arith.constant 0 : index
    %c0_9 = arith.constant 0 : index
    %c0_10 = arith.constant 0 : index
    %27 = vector.load %arg2[%c0_8, %c0_9, %c0_10] : memref<1x16x32xf32, #tpu.memory_space<vmem>>, vector<1x1x32xf32>
    tpu.vector_store %arg2[%c0_8, %c0_9, %c0_10], %26 {strides = array<i32>} : memref<1x16x32xf32, #tpu.memory_space<vmem>>, vector<1x1x32xf32>,
    %28 = vector.extract_strided_slice %9 {offsets = [0, 11, 0], sizes = [1, 1, 32], strides = [1, 1, 1]} : vector<1x12x32xf32> to vector<1x1x32xf32>
    %29 = vector.extract_strided_slice %0 {offsets = [0, 11, 0], sizes = [1, 1, 32], strides = [1, 1, 1]} : vector<1x16x32xf32> to vector<1x1x32xf32>
    %30 = arith.subf %28, %29 : vector<1x1x32xf32>
    %31 = arith.addf %30, %14 : vector<1x1x32xf32>
    %cst_11 = arith.constant 2.000000e-01 : f32
    %32 = vector.broadcast %cst_11 : f32 to vector<1x1x32xf32>
    %33 = arith.mulf %31, %32 : vector<1x1x32xf32>
    %c0_12 = arith.constant 0 : index
    %c14 = arith.constant 14 : index
    %c0_13 = arith.constant 0 : index
    %34 = vector.load %arg2[%c0_12, %c14, %c0_13] : memref<1x16x32xf32, #tpu.memory_space<vmem>>, vector<1x1x32xf32>
    tpu.vector_store %arg2[%c0_12, %c14, %c0_13], %33 {strides = array<i32>} : memref<1x16x32xf32, #tpu.memory_space<vmem>>, vector<1x1x32xf32>,
    %35 = vector.extract_strided_slice %0 {offsets = [0, 12, 0], sizes = [1, 1, 32], strides = [1, 1, 1]} : vector<1x16x32xf32> to vector<1x1x32xf32>
    %36 = arith.subf %31, %35 : vector<1x1x32xf32>
    %37 = arith.addf %36, %14 : vector<1x1x32xf32>
    %cst_14 = arith.constant 2.000000e-01 : f32
    %38 = vector.broadcast %cst_14 : f32 to vector<1x1x32xf32>
    %39 = arith.mulf %37, %38 : vector<1x1x32xf32>
    %c0_15 = arith.constant 0 : index
    %c15 = arith.constant 15 : index
    %c0_16 = arith.constant 0 : index
    %40 = vector.load %arg2[%c0_15, %c15, %c0_16] : memref<1x16x32xf32, #tpu.memory_space<vmem>>, vector<1x1x32xf32>
    tpu.vector_store %arg2[%c0_15, %c15, %c0_16], %39 {strides = array<i32>} : memref<1x16x32xf32, #tpu.memory_space<vmem>>, vector<1x1x32xf32>,
    return
  }
  func.func @transform_0(%arg0: i32) -> (i32, i32, i32) {
    %c0_i32 = arith.constant 0 : i32
    %c0_i32_0 = arith.constant 0 : i32
    %c0_i32_1 = arith.constant 0 : i32
    return %arg0, %c0_i32, %c0_i32_0 : i32, i32, i32
  }
  func.func @transform_1(%arg0: i32) -> (i32, i32, i32) {
    %c0_i32 = arith.constant 0 : i32
    %c0_i32_0 = arith.constant 0 : i32
    %c0_i32_1 = arith.constant 0 : i32
    return %arg0, %c0_i32, %c0_i32_0 : i32, i32, i32
  }
}

</mosaic_0001>

<bundles_post_ra>
// kernel: tpu_custom_call.1
= control target key start
LH: loop header
LB: loop body
LE: loop exit
PB: predicated region body
PF: predicated region fallthrough
CT: control target
= control target key end

     0   :  { %6 = vsyncpa [#allocation3], 0  ;;  %s594_s0 = inlined_call_operand.hbm [shape: f32[2,16,32], index: 0, kind: input, shape index: {}]   ;;  %s595_s1 = inlined_call_operand.hbm [shape: f32[2,16,32], index: 1, kind: output, shape index: {}]  }
   0x1   :  { %8 = vsyncpa [#allocation3 + $0x1], 0 }
   0x2   :  { %9 = vsyncpa [#allocation4], 0 }
   0x3   :  { %11 = vsyncpa [#allocation4 + $0x1], 0  ;;  %s461_s6 = smov 0   ;;  %s463_s7 = smov 0  }
   0x4   :  { %s465_s8 = smov 0   ;;  %s467_s9 = smov 0  }
   0x5 LB: > { %s482_s10 = sadd.s32 4294967295, %s445_s9   ;;  %s283_s11 = sadd.s32 4294967294, %s445_s9   ;;  %s445_s9 = sphi %s467_s9, %s605_s9   ;;  %s441_s8 = sphi %s465_s8, %s604_s8   ;;  %s437_s7 = sphi %s463_s7, %s603_s7   ;;  %s433_s6 = sphi %s461_s6, %s602_s6  }
   0x6   : > { %s486_s12 = sadd.s32 1, %s445_s9   ;;  %s24_s13 = sadd.s32 1, %s441_s8 }
   0x7   : > { %s21_s14 = ssub.s32 %s445_s9, %s486_s12  ;;  %p31_p0 = scmp.ne.s32.totalorder %s441_s8, %s437_s7 }
   0x8   : > { %p22_p1 = scmp.eq.s32.totalorder %s21_s14, 0  ;;  %p32_p2 = scmp.eq.s32.totalorder %s445_s9, 0 }
   0x9   : > { %p37_p3 = scmp.ne.s32.totalorder %s437_s7, %s433_s6  ;;  %p38_p4 = scmp.eq.s32.totalorder %s482_s10, 0 }
   0xa   : > { %s498_s15 = scalar_select %p22_p1, %s441_s8, %s24_s13  }
   0xb   : > { %p500_p5 = por %p32_p2, %p31_p0  ;;  %p504_p6 = por %p38_p4, %p37_p3 }
   0xc   : > { %p61_p7 = scmp.eq.s32.totalorder %s482_s10, 1  ;;  %p67_p8 = scmp.eq.s32.totalorder %s283_s11, 1 }
   0xd   : > { %p311_p10 = scmp.lt.s32.totalorder %s445_s9, 2  ;;  %s87_s20 = sand.u32 1, %s441_s8  }
   0xe   : > { %p511_p11 = por %p61_p7, %p31_p0  ;;  %p515_p12 = por %p67_p8, %p37_p3 }
   0xf   : > { %s297_s21 = sshll.u32 %s445_s9, 4  ;;  %s286_s22 = sshll.u32 %s87_s20, 4 }
  0x10   : > { %s96_s25 = scalar_lea.hbm %s594_s0, %s297_s21  ;;  %s91_s27 = scalar_lea.vmem [#allocation2], %s286_s22 }
  0x11   : > { %s97_s26 = sshll.u32 %s96_s25, 4  ;;  %s99_s28 = sshll.u32 %s91_s27, 4  ;;  %s98_s26 = int_to_ptr.hbm [resolvable:$true] %s97_s26  ;;  %s100_s28 = int_to_ptr.vmem [resolvable:$true] %s99_s28 }
  0x12   : > { %p526_p13 = pnand %p311_p10, %p500_p5  ;;  %p289_p0 = scmp.ge.s32.totalorder %s445_s9, 1 }
  0x13   : > { %p107_p1 = scmp.lt.s32.totalorder %s445_s9, 3  ;;  %s88_s30 = scalar_lea.sflag [#allocation3], %s87_s20 }
  0x14   : > { %s349_s2 = sshra.s32 %s98_s26, 4  ;;  %p353_p3 = pneg %p526_p13  ;;  %s350_s2 = int_to_ptr.hbm [resolvable:$true] %s349_s2 }
  0x15   : > { %s351_s3 = scalar_lea.hbm %s350_s2, 16  ;;  %s356_s11 = scalar_lea.hbm %s594_s0, 32 }
  0x16   : > { %p352_p2 = scmp.ne.s32.totalorder %s350_s2, %s351_s3  ;;  %p357_p5 = scmp.lt.s32.totalorder %s350_s2, %s594_s0 }
  0x17   : > { %p358_p8 = scmp.lt.s32.totalorder %s356_s11, %s351_s3 }
  0x18   : > { %p354_p4 = pnand %p353_p3, %p352_p2 }
  0x19   : > { %p359_p10 = por %p358_p8, %p357_p5 }
  0x1a   : > { %p355_p7 = pneg %p354_p4 }
  0x1c   : > { %p360_p9 = pnand %p359_p10, %p355_p7 }
  0x1e   : > { %363 = shalt.err (!%p360_p9)
}
  0x1f   : > { %s447_s16 = smov 128   ;;  %s448_s20 = smov 8  }
  0x20   : > { %306 = dma.hbm_to_vmem [thread:$0]  (!%p526_p13), %s98_s26, 256, %s100_s28, %s88_s30, %s447_s16, %s447_s16, %s448_s20  }
  0x21   : > { %p108_p2 = pnand %p289_p0, %p107_p1 }
  0x22   : > { %s547_s21 = sand.u32 (!%p108_p2), 1, %s437_s7  }
  0x23   : > { %111 = sbr.rel (%p108_p2) target bundleno = 68 (0x44), region = 24  ;;  %s290_s22 = sshll.u32 (!%p108_p2), %s547_s21, 4 }
  0x24   : > { %s114_s23 = scalar_lea.sflag (!%p108_p2), [#allocation3], %s547_s21  ;;  %s117_s24 = scalar_lea.vmem (!%p108_p2), [#allocation2], %s290_s22 }
  0x28   : > { %424 = dma.done.wait (%p504_p6), %s114_s23, 256  }
  0x29   : > { %426 = vsyncadd (%p504_p6), %s114_s23, 4294967040  ;;  %v137_v0 = vld [vmem:[%s117_s24] sm:$0xff]  ;;  %v138_v1 = vld [vmem:[%s117_s24 + $0x8] sm:$0xff]  ;;  %vm141_vm0 = vcmask 1046528   ;;  %vm151_vm1 = vcmask 1045504   ;;  %vm159_vm2 = vcmask 1043456  }
  0x2a   : > { %v142_v2 = vrot.slane %v137_v0, 1  ;;  %v143_v3 = vrot.slane %v138_v1, 1  ;;  %v160_v7 = vrot.slane %v137_v0, 4  ;;  %v161_v8 = vrot.slane %v138_v1, 4  ;;  %s298_s17 = sshll.u32 %s482_s10, 4  ;;  %s136_s25 = scalar_lea.vmem [#allocation5], %s290_s22 }
  0x2b   : > { %vm171_vm3 = vcmask 257024   ;;  %vm169_vm4 = vcmask 261120   ;;  %vm188_vm5 = vcmask 257027   ;;  %v180_v23 = vrot.slane %v137_v0, 3  ;;  %s206_s28 = scalar_lea.hbm %s595_s1, %s298_s17  ;;  %s207_s29 = sshll.u32 %s136_s25, 4  ;;  %s208_s29 = int_to_ptr.vmem [resolvable:$true] %s207_s29 }
  0x2c   : > { %v144_v4 = vsel %vm141_vm0, %v142_v2, %v143_v3  ;;  %v148_v5 = vadd.f32 %v143_v3, %v138_v1  ;;  %v162_v13 = vsel %vm159_vm2, %v160_v7, %v161_v8  ;;  %vm177_vm6 = vcmask 253952   ;;  %s209_s10 = sshll.u32 %s206_s28, 4  ;;  %s195_s30 = scalar_lea.sflag [#allocation4], %s547_s21  ;;  %s210_s10 = int_to_ptr.hbm [resolvable:$true] %s209_s10 }
  0x2d   : > { %v147_v6 = vadd.f32 %v144_v4, %v137_v0  ;;  %s393_s2 = sshra.s32 %s210_s10, 4  ;;  %s399_s11 = scalar_lea.hbm %s595_s1, 32  ;;  %s394_s2 = int_to_ptr.hbm [resolvable:$true] %s393_s2 }
  0x2e   : > { %v153_v9 = vrot.slane %v148_v5, 2  ;;  %s395_s3 = scalar_lea.hbm %s394_s2, 16  ;;  %p400_p0 = scmp.lt.s32.totalorder %s394_s2, %s595_s1 }
  0x2f   : > { %v152_v10 = vrot.slane %v147_v6, 2  ;;  %p396_p6 = scmp.ne.s32.totalorder %s394_s2, %s395_s3  ;;  %p401_p1 = scmp.lt.s32.totalorder %s399_s11, %s395_s3 }
  0x30   : > { %v158_v11 = vadd.f32 %v153_v9, %v148_v5 }
  0x31   : > { %v154_v12 = vsel %vm151_vm1, %v152_v10, %v153_v9  ;;  %p397_p9 = pnand %p396_p6, %p511_p11  ;;  %p402_p3 = por %p401_p1, %p400_p0 }
  0x32   : > { %v157_v14 = vadd.f32 %v154_v12, %v147_v6  ;;  %v166_v15 = vadd.f32 %v161_v8, %v158_v11 }
  0x33   : > { %p398_p13 = pneg %p397_p9 }
  0x34   : > { %v165_v16 = vadd.f32 %v162_v13, %v157_v14  ;;  %v168_v17 = vmul.f32 0.2, %v166_v15  ;;  %v185_v18 = vsub.f32 %v166_v15, %v138_v1 }
  0x35   : > { %p403_p4 = pnand %p402_p3, %p398_p13 }
  0x36   : > { %v167_v19 = vmul.f32 0.2, %v165_v16  ;;  %172 = vst.msk [vmem:[%s136_s25 + $0xa] sm:$0xf] %vm171_vm3, %v168_v17  ;;  %v173_v20 = vadd.f32 %v165_v16, %v137_v0  ;;  %v186_v21 = vadd.f32 %v185_v18, %v161_v8 }
  0x38   : > { %170 = vst.msk [vmem:[%s136_s25 + $0x2] sm:$0xff] %vm169_vm4, %v167_v19  ;;  %v175_v22 = vsub.f32 %v173_v20, %v160_v7  ;;  %v187_v24 = vmul.f32 0.2, %v186_v21  ;;  %v190_v25 = vsub.f32 %v186_v21, %v143_v3 }
  0x3a   : > { %v176_v26 = vmul.f32 0.2, %v175_v22  ;;  %v179_v27 = vadd.f32 %v175_v22, %v137_v0  ;;  %189 = vst.msk [vmem:[%s136_s25 + $0xb] sm:$0x8] %vm188_vm5, %v187_v24  ;;  %v191_v28 = vadd.f32 %v190_v25, %v161_v8 }
  0x3c   : > { %178 = vst.msk [vmem:[%s136_s25 + $0x1] sm:$0x1] %vm177_vm6, %v176_v26  ;;  %v182_v29 = vsub.f32 %v179_v27, %v180_v23  ;;  %v192_v30 = vmul.f32 0.2, %v191_v28 }
  0x3e   : > { %v183_v31 = vmul.f32 0.2, %v182_v29  ;;  %193 = vst.msk [vmem:[%s136_s25 + $0xc] sm:$0x8] %vm188_vm5, %v192_v30 }
  0x40   : > { %184 = vst.msk [vmem:[%s136_s25] sm:$0x1] %vm177_vm6, %v183_v31 }
  0x41   : > { %406 = shalt.err (!%p403_p4)
}
  0x42   : > { %s449_s16 = smov 128   ;;  %s450_s20 = smov 8  }
  0x43   : > { %301 = dma.vmem_to_hbm [thread:$0]  (%p511_p11), %s208_s29, 256, %s210_s10, %s195_s30, %s449_s16, %s449_s16, %s450_s20  }
  0x44 PF: > { %s224_s21 = sand.u32 1, %s433_s6   ;;  %p601_p7 = scmp.ge.s32.totalorder %s445_s9, 2 }
  0x45   : > { %s225_s22 = scalar_lea.sflag [#allocation4], %s224_s21 }
  0x46   : > { %p308_p5 = pnand %p601_p7, %p515_p12 }
  0x48   : > { %p309_p8 = pneg %p308_p5 }
  0x4a   : > { %428 = dma.done.wait (%p309_p8), %s225_s22, 256  }
  0x4b   : > { %430 = vsyncadd (%p309_p8), %s225_s22, 4294967040  ;;  %p14_p10 = scmp.ge.s32.totalorder %s486_s12, 4   ;;  %s602_s6 = smov %s437_s7 }
  0x4c   : > { %s603_s7 = smov %s441_s8  ;;  %s604_s8 = smov %s498_s15 }
  0x4d   : > { %s605_s9 = smov %s486_s12  ;;  %16 = sbr.rel (!%p14_p10) target bundleno = 5 (0x5), region = 69 }
  0x52   :  { %231 = vsyncpa [#allocation3], 1 }
  0x53   :  { %233 = vsyncpa [#allocation3 + $0x1], 1 }
  0x54   :  { %234 = vsyncpa [#allocation4], 1 }
  0x55   :  { %236 = vsyncpa [#allocation4 + $0x1], 1 }

</bundles_post_ra>
